<compile_context>
chip_gen: v7x
topology: tpu7x:2x2x1
jax: 0.10.0
libtpu: 0.0.40
codegen_flags: <defaults>
</compile_context>

<pallas_src>
import jax
import jax.numpy as jnp
from jax.experimental import pallas as pl
from jax.experimental.pallas import tpu as pltpu

_MAX_DMA_CHUNKS = 4            # a few concurrent DMAs is plenty for a memcpy
_MIN_CHUNK_BYTES = 4 << 20     # do not bother chunking below ~4 MiB per chunk


def _row_quantum(dtype):
    """Sublane quantum for the dtype (alignment of chunk starts along axis 0)."""
    itemsize = jnp.dtype(dtype).itemsize
    return {4: 8, 2: 16, 1: 32}.get(itemsize, 8)


def _chunk_bounds(rows, num_chunks, quantum):
    """Static (start, size) chunks along axis 0; starts are quantum-aligned."""
    if num_chunks <= 1 or rows <= quantum:
        return [(0, rows)]
    per = -(-rows // num_chunks)                       # ceil divide
    per = -(-per // quantum) * quantum                 # round up to quantum
    bounds = []
    start = 0
    while start < rows:
        size = min(per, rows - start)
        bounds.append((start, size))
        start += size
    return bounds


def _build_dma_copy_kernel(chunk_bounds):
    """Kernel issuing one HBM->HBM DMA per (start, size) chunk along axis 0."""
    if len(chunk_bounds) == 1:
        def kernel(x_hbm, o_hbm, sems):
            cp = pltpu.make_async_copy(x_hbm, o_hbm, sems.at[0])
            cp.start()
            cp.wait()
        return kernel

    def kernel(x_hbm, o_hbm, sems):
        copies = []
        for c, (start, size) in enumerate(chunk_bounds):
            cp = pltpu.make_async_copy(
                x_hbm.at[pl.ds(start, size)],
                o_hbm.at[pl.ds(start, size)],
                sems.at[c])
            cp.start()                 # issue every chunk DMA first ...
            copies.append(cp)
        for cp in copies:              # ... then drain them all
            cp.wait()
    return kernel


def pallas_identity_copy(obs, num_chunks=None):
    """Materialized copy of obs via direct HBM->HBM DMA (no VMEM staging).

    Only needed when a physically distinct buffer is required;
    IdentityEncoder.forward itself returns obs with no kernel launch.
    """
    orig_shape = obs.shape
    x = obs if obs.ndim >= 1 else obs.reshape(1)
    itemsize = jnp.dtype(x.dtype).itemsize
    nbytes = x.size * itemsize
    rows = x.shape[0]

    if num_chunks is None:
        # Only split when each chunk stays comfortably large (pure DMA work;
        # chunking tiny copies just adds descriptors).
        num_chunks = min(_MAX_DMA_CHUNKS, max(1, nbytes // _MIN_CHUNK_BYTES))
    num_chunks = max(1, min(int(num_chunks), rows))
    if x.ndim < 2:
        num_chunks = 1                 # 1-D obs: single whole-ref DMA

    bounds = _chunk_bounds(rows, num_chunks, _row_quantum(x.dtype))
    kernel = _build_dma_copy_kernel(bounds)

    out = pl.pallas_call(
        kernel,
        out_shape=jax.ShapeDtypeStruct(x.shape, x.dtype),
        in_specs=[pl.BlockSpec(memory_space=pl.ANY)],
        out_specs=pl.BlockSpec(memory_space=pl.ANY),
        scratch_shapes=[pltpu.SemaphoreType.DMA((len(bounds),))],
        cost_estimate=pl.CostEstimate(
            flops=0, transcendentals=0, bytes_accessed=2 * nbytes),
    )(x)
    return out.reshape(orig_shape)


class IdentityEncoder:
    """JAX/Pallas mirror of the PyTorch IdentityEncoder module."""

    def __init__(self, obs_shape, feature_dim, num_layers, num_filters):
        assert len(obs_shape) == 1
        self.feature_dim = obs_shape[0]
        # No parameters — the module is stateless.

    def forward(self, obs, detach=False, materialize=False):
        # True identity: no kernel, no HBM traffic, no launch overhead.
        # `detach` is ignored, matching the PyTorch reference.
        # If only a fusion/materialization anchor is needed (not a real copy),
        # use jax.lax.optimization_barrier(obs) instead of materialize=True.
        if materialize:
            return pallas_identity_copy(obs)
        return obs

    def copy_conv_weights_from(self, source):
        pass  # no conv weights

    def log(self, L, step, log_freq):
        pass  # no-op


if __name__ == "__main__":
    key = jax.random.PRNGKey(0)

    # Shapes implied by the module: flat 1-D observations, batched -> (B, D).
    batch, feature_dim = 2, 32
    obs = jax.random.normal(key, (batch, feature_dim), dtype=jnp.float32)

    enc = IdentityEncoder(obs_shape=(feature_dim,), feature_dim=feature_dim,
                          num_layers=0, num_filters=0)

    # 1) True forward path: zero-cost identity (no kernel launch).
    out = jax.block_until_ready(enc.forward(obs))
    assert out.shape == obs.shape and out.dtype == obs.dtype
    assert bool(jnp.all(out == obs))

    # 2) Materialized copy: single direct HBM->HBM DMA.
    out_copy = jax.block_until_ready(enc.forward(obs, materialize=True))
    assert out_copy.shape == obs.shape and out_copy.dtype == obs.dtype
    assert bool(jnp.all(out_copy == obs))

    # 3) Chunked-DMA path (forced): sublane-aligned chunk starts + ragged tail.
    obs2 = jax.random.normal(jax.random.PRNGKey(1), (20, 256), dtype=jnp.float32)
    out2 = jax.block_until_ready(pallas_identity_copy(obs2, num_chunks=3))
    assert out2.shape == obs2.shape and out2.dtype == obs2.dtype
    assert bool(jnp.all(out2 == obs2))

    # 4) 1-D obs (module's obs_shape is a flat observation vector).
    obs3 = jax.random.normal(jax.random.PRNGKey(2), (64,), dtype=jnp.float32)
    out3 = jax.block_until_ready(pallas_identity_copy(obs3))
    assert out3.shape == obs3.shape and out3.dtype == obs3.dtype
    assert bool(jnp.all(out3 == obs3))

    print("KERNEL_OK")
</pallas_src>

<mosaic_0001>
module attributes {stable_mosaic.version = 11 : i64} {
  func.func @kernel(%arg0: memref<2x32xf32, #tpu.memory_space<any>>, %arg1: memref<2x32xf32, #tpu.memory_space<any>>, %arg2: memref<1x!tpu.dma_semaphore, #tpu.memory_space<semaphore_mem>>) attributes {dimension_semantics = [], scalar_prefetch = 0 : i64, scratch_operands = 1 : i64, tpu.core_type = #tpu.core_type<tc>} {
    %c0_i32 = arith.constant 0 : i32
    %0 = tpu.memref_slice %arg2[%c0_i32] : memref<1x!tpu.dma_semaphore, #tpu.memory_space<semaphore_mem>> -> memref<1x!tpu.dma_semaphore, #tpu.memory_space<semaphore_mem>>
    %1 = tpu.memref_squeeze %0 : memref<1x!tpu.dma_semaphore, #tpu.memory_space<semaphore_mem>> -> memref<!tpu.dma_semaphore, #tpu.memory_space<semaphore_mem>>
    tpu.enqueue_dma source(%arg0 : memref<2x32xf32, #tpu.memory_space<any>>) target(%arg1 : memref<2x32xf32, #tpu.memory_space<any>>) target_semaphore(%1 : memref<!tpu.dma_semaphore, #tpu.memory_space<semaphore_mem>>)
    %c0_i32_0 = arith.constant 0 : i32
    %2 = tpu.memref_slice %arg2[%c0_i32_0] : memref<1x!tpu.dma_semaphore, #tpu.memory_space<semaphore_mem>> -> memref<1x!tpu.dma_semaphore, #tpu.memory_space<semaphore_mem>>
    %3 = tpu.memref_squeeze %2 : memref<1x!tpu.dma_semaphore, #tpu.memory_space<semaphore_mem>> -> memref<!tpu.dma_semaphore, #tpu.memory_space<semaphore_mem>>
    tpu.wait_dma2 semaphore(%3 : memref<!tpu.dma_semaphore, #tpu.memory_space<semaphore_mem>>) src(%arg0 : memref<2x32xf32, #tpu.memory_space<any>>) dst(%arg1 : memref<2x32xf32, #tpu.memory_space<any>>)
    return
  }
}

</mosaic_0001>

<bundles_post_ra>
// kernel: tpu_custom_call.1
= control target key start
LH: loop header
LB: loop body
LE: loop exit
PB: predicated region body
PF: predicated region fallthrough
CT: control target
= control target key end

     0   :  { %s34_s6 = smov [#allocation2]   ;;  %s35_s7 = smov [#allocation3]   ;;  %s53_s0 = inlined_call_operand.hbm [shape: f32[2,32], index: 0, kind: input, shape index: {}]   ;;  %s54_s1 = inlined_call_operand.hbm [shape: f32[2,32], index: 1, kind: output, shape index: {}]  }
   0x1   :  { %s36_s8 = smov 0  }
   0x2   :  { %18 = dma.general %s53_s0, 32, %s54_s1, %s34_s6, %s35_s7, [#allocation4], %s36_s8, 0  }
   0x3   :  { %32 = dma.done.wait [#allocation2], 32 }
   0x4   :  { %33 = vsyncadd [#allocation2], 4294967264 }
   0x5   :  { %22 = vsyncmov [#allocation2] }
   0x8   :  { %s23_s13 = vpop.sfrf %22 }
   0x9   :  { %p28_p0 = scmp.ne.s32.totalorder %s23_s13, 0 }
   0xb   :  { %27 = shalt.err (%p28_p0)  }

</bundles_post_ra>
